<compile_context>
chip_gen: v7x
topology: tpu7x:2x2x1
jax: 0.10.0
libtpu: 0.0.40
codegen_flags: <defaults>
</compile_context>

<pallas_src>
import functools
import math

import jax
import jax.numpy as jnp
from jax.experimental import pallas as pl
from jax.experimental.pallas import tpu as pltpu


def _round_up(x, m):
    return (x + m - 1) // m * m


def _siren_kernel(w0, x_ref, wt_ref, b_ref, o_ref):
    # x_ref: (TB, K), wt_ref: (K, TN), b_ref: (1, TN), o_ref: (TB, TN)
    acc = jnp.dot(x_ref[...], wt_ref[...], preferred_element_type=jnp.float32)
    acc = acc + b_ref[...]              # bias broadcast (1, TN)
    if w0 != 1.0:                       # static Python check; trace-time elision
        acc = acc * w0
    o_ref[...] = jnp.sin(acc).astype(o_ref.dtype)


def siren_forward(x, weight, bias, w0=1.0, tb=512, tn=512):
    """x: (B, dim_in) f32, weight: (dim_out, dim_in) f32, bias: (dim_out,) f32."""
    B, dim_in = x.shape
    dim_out = weight.shape[0]
    K = dim_in                              # contracted dim, untiled (full extent)
    itemsize = jnp.dtype(x.dtype).itemsize

    # One-time (tiny) layout plumbing on the weight so the kernel matmul needs
    # no per-tile transpose/relayout; bias presented as a (1, dim_out) row.
    wt = weight.T                           # (dim_in, dim_out)
    b2 = bias.reshape(1, dim_out)

    # --- N (dim_out) tiling -------------------------------------------------
    # Keep the whole weight resident whenever it fits comfortably in VMEM:
    # TN = dim_out (the "equals full array dim" exception to the 128 rule),
    # so x is streamed from HBM exactly once.  Otherwise tile N in multiples
    # of 256 (feeds the 2x256^2 MXU on v6e/v7x; 128-divisible for v5e too).
    if dim_out * K * itemsize <= 8 * 1024 * 1024 or dim_out <= tn:
        TN = dim_out
    else:
        TN = _round_up(tn, 256)

    # --- batch tiling -------------------------------------------------------
    TB = min(_round_up(tb, 8), _round_up(B, 8))
    # Keep the double-buffered VMEM footprint (x, wt, bias, out blocks) under a
    # conservative cross-generation budget (v7x has only 64 MiB physical VMEM).
    vmem_budget = 24 * 1024 * 1024
    while TB > 8 and 2 * itemsize * (TB * K + K * TN + TN + TB * TN) > vmem_budget:
        TB = _round_up(TB // 2, 8)

    n_tiles = pl.cdiv(dim_out, TN)
    b_tiles = pl.cdiv(B, TB)
    # N outer, batch inner: the weight/bias tiles (index_map constant in the
    # inner axis) stay VMEM-resident across the whole batch sweep.
    grid = (n_tiles, b_tiles)

    kernel = functools.partial(_siren_kernel, float(w0))

    out = pl.pallas_call(
        kernel,
        out_shape=jax.ShapeDtypeStruct((B, dim_out), x.dtype),
        grid=grid,
        in_specs=[
            pl.BlockSpec((TB, K), lambda j, i: (i, 0)),    # x tile (lane dim = full K)
            pl.BlockSpec((K, TN), lambda j, i: (0, j)),    # weight tile (resident over i)
            pl.BlockSpec((1, TN), lambda j, i: (0, j)),    # bias tile
        ],
        out_specs=pl.BlockSpec((TB, TN), lambda j, i: (i, j)),
        compiler_params=pltpu.CompilerParams(
            dimension_semantics=("parallel", "parallel"),
            vmem_limit_bytes=48 * 1024 * 1024,   # within v7x 64 MiB physical budget
        ),
        cost_estimate=pl.CostEstimate(
            flops=2 * B * dim_in * dim_out,
            transcendentals=B * dim_out,
            bytes_accessed=itemsize
            * (B * dim_in * n_tiles          # x streamed once per N tile
               + dim_out * dim_in            # weight
               + dim_out                     # bias
               + B * dim_out),               # output
        ),
    )(x, wt, b2)

    return out


def init_siren_params(key, dim_in, dim_out, w0=1.0, c=6.0, is_first=False):
    """Deterministic uniform init matching Siren.init_."""
    w_std = (1.0 / dim_in) if is_first else (math.sqrt(c / dim_in) / w0)
    kw, kb = jax.random.split(key)
    weight = jax.random.uniform(
        kw, (dim_out, dim_in), dtype=jnp.float32, minval=-w_std, maxval=w_std
    )
    bias = jax.random.uniform(
        kb, (dim_out,), dtype=jnp.float32, minval=-w_std, maxval=w_std
    )
    return weight, bias


if __name__ == "__main__":
    key = jax.random.PRNGKey(0)
    k_x1, k_x2, k_p1, k_p2 = jax.random.split(key, 4)

    # Test 1: hidden-layer style (w0=1.0): kernel elides the w0 multiply.
    batch, dim_in, dim_out = 8, 16, 32
    x1 = jax.random.normal(k_x1, (batch, dim_in), dtype=jnp.float32)
    w0_h = 1.0
    weight_h, bias_h = init_siren_params(k_p1, dim_in, dim_out, w0=w0_h, c=6.0, is_first=False)
    out_h = jax.block_until_ready(siren_forward(x1, weight_h, bias_h, w0=w0_h))
    ref_h = jnp.sin(w0_h * (x1 @ weight_h.T + bias_h[None, :]))
    assert out_h.shape == (batch, dim_out)
    assert jnp.allclose(out_h, ref_h, atol=1e-5, rtol=1e-5)

    # Test 2: SatCLIP-style first layer (dim_in=2, w0=30), ragged batch / dim_out
    # exercise the unpadded partial-block path.
    batch, dim_in, dim_out = 10, 2, 48
    x2 = jax.random.normal(k_x2, (batch, dim_in), dtype=jnp.float32)
    w0_f = 30.0
    weight_f, bias_f = init_siren_params(k_p2, dim_in, dim_out, w0=w0_f, c=6.0, is_first=True)
    out_f = jax.block_until_ready(siren_forward(x2, weight_f, bias_f, w0=w0_f))
    ref_f = jnp.sin(w0_f * (x2 @ weight_f.T + bias_f[None, :]))
    assert out_f.shape == (batch, dim_out)
    assert jnp.allclose(out_f, ref_f, atol=1e-4, rtol=1e-4)

    print("KERNEL_OK")
</pallas_src>

<mosaic_0001>
module attributes {stable_mosaic.version = 11 : i64} {
  func.func @_siren_kernel(%arg0: i32, %arg1: i32, %arg2: memref<8x16xf32, #tpu.memory_space<vmem>>, %arg3: memref<16x32xf32, #tpu.memory_space<vmem>>, %arg4: memref<1x32xf32, #tpu.memory_space<vmem>>, %arg5: memref<8x32xf32, #tpu.memory_space<vmem>>) attributes {dimension_semantics = [#tpu.dimension_semantics<parallel>, #tpu.dimension_semantics<parallel>], iteration_bounds = array<i64: 1, 1>, scalar_prefetch = 0 : i64, scratch_operands = 0 : i64, tpu.core_type = #tpu.core_type<tc>, window_params = [{transform_indices = @transform_0, window_bounds = array<i64: 8, 16>}, {transform_indices = @transform_1, window_bounds = array<i64: 16, 32>}, {transform_indices = @transform_2, window_bounds = array<i64: 1, 32>}, {transform_indices = @transform_3, window_bounds = array<i64: 8, 32>}]} {
    %c0 = arith.constant 0 : index
    %c0_0 = arith.constant 0 : index
    %0 = vector.load %arg2[%c0, %c0_0] : memref<8x16xf32, #tpu.memory_space<vmem>>, vector<8x16xf32>
    %c0_1 = arith.constant 0 : index
    %c0_2 = arith.constant 0 : index
    %1 = vector.load %arg3[%c0_1, %c0_2] : memref<16x32xf32, #tpu.memory_space<vmem>>, vector<16x32xf32>
    %cst = arith.constant dense<0.000000e+00> : vector<8x32xf32>
    %2 = tpu.matmul %0, %1, %cst {dimension_numbers = #tpu.dot_dimension_numbers<[1], [0], [0], [1], [0, 0, 1, 1], [], []>} : vector<8x16xf32>, vector<16x32xf32>, vector<8x32xf32> -> vector<8x32xf32>
    %c0_3 = arith.constant 0 : index
    %c0_4 = arith.constant 0 : index
    %3 = vector.load %arg4[%c0_3, %c0_4] : memref<1x32xf32, #tpu.memory_space<vmem>>, vector<1x32xf32>
    %4 = vector.broadcast %3 : vector<1x32xf32> to vector<8x32xf32>
    %5 = arith.addf %2, %4 : vector<8x32xf32>
    %6 = math.sin %5 : vector<8x32xf32>
    %c0_5 = arith.constant 0 : index
    %c0_6 = arith.constant 0 : index
    %7 = vector.load %arg5[%c0_5, %c0_6] : memref<8x32xf32, #tpu.memory_space<vmem>>, vector<8x32xf32>
    tpu.vector_store %arg5[%c0_5, %c0_6], %6 {strides = array<i32>} : memref<8x32xf32, #tpu.memory_space<vmem>>, vector<8x32xf32>,
    return
  }
  func.func @transform_0(%arg0: i32, %arg1: i32) -> (i32, i32) {
    %c0_i32 = arith.constant 0 : i32
    %c0_i32_0 = arith.constant 0 : i32
    return %arg1, %c0_i32 : i32, i32
  }
  func.func @transform_1(%arg0: i32, %arg1: i32) -> (i32, i32) {
    %c0_i32 = arith.constant 0 : i32
    %c0_i32_0 = arith.constant 0 : i32
    return %c0_i32, %arg0 : i32, i32
  }
  func.func @transform_2(%arg0: i32, %arg1: i32) -> (i32, i32) {
    %c0_i32 = arith.constant 0 : i32
    %c0_i32_0 = arith.constant 0 : i32
    return %c0_i32, %arg0 : i32, i32
  }
  func.func @transform_3(%arg0: i32, %arg1: i32) -> (i32, i32) {
    %c0_i32 = arith.constant 0 : i32
    return %arg1, %arg0 : i32, i32
  }
}

</mosaic_0001>

<bundles_post_ra>
// kernel: tpu_custom_call.1
= control target key start
LH: loop header
LB: loop body
LE: loop exit
PB: predicated region body
PF: predicated region fallthrough
CT: control target
= control target key end

     0   :  { %8 = vsyncpa [#allocation3], 0  ;;  %s461_s0 = inlined_call_operand.hbm [shape: f32[8,16], index: 0, kind: input, shape index: {}]   ;;  %s462_s1 = inlined_call_operand.hbm [shape: f32[16,32], index: 1, kind: input, shape index: {}]   ;;  %s463_s2 = inlined_call_operand.vmem [shape: f32[1,32], index: 2, kind: input, shape index: {}]   ;;  %s464_s3 = inlined_call_operand.hbm [shape: f32[8,32], index: 3, kind: output, shape index: {}]  }
   0x1   :  { %9 = vsyncpa [#allocation6], 0 }
   0x2   :  { %10 = vsyncpa [#allocation4], 0  ;;  %s360_s12 = smov [#allocation2]   ;;  %s361_s14 = smov [#allocation5]  }
   0x3   :  { %s17_s13 = sshll.u32 %s360_s12, 4  ;;  %s26_s15 = sshll.u32 %s361_s14, 4  ;;  %s18_s13 = int_to_ptr.vmem [resolvable:$true] %s17_s13  ;;  %s394_s15 = int_to_ptr.vmem [resolvable:$true] %s26_s15 }
   0x4   :  { %s288_s18 = scalar_lea.hbm %s461_s0, 128 }
   0x5   :  { %p289_p0 = scmp.ne.s32.totalorder %s461_s0, %s288_s18  ;;  %p292_p1 = scmp.lt.u32.totalorder %s288_s18, %s461_s0 }
   0x7   :  { %p294_p2 = pnand %p292_p1, %p289_p0 }
   0x9   :  { %297 = shalt.err (!%p294_p2)
}
   0xa   :  { %s298_s23 = scalar_lea.vmem %s18_s13, 128  ;;  %p303_p4 = scmp.lt.s32.totalorder %s18_s13, %s18_s13 }
   0xb   :  { %p299_p3 = scmp.ne.s32.totalorder %s18_s13, %s298_s23  ;;  %p304_p5 = scmp.lt.s32.totalorder %s298_s23, %s298_s23 }
   0xd   :  { %p305_p6 = por %p304_p5, %p303_p4 }
   0xf   :  { %p306_p7 = pnand %p305_p6, %p299_p3 }
  0x11   :  { %309 = shalt.err (!%p306_p7)
}
  0x12   :  { %20 = dma.hbm_to_vmem [thread:$0]  %s461_s0, 128, %s18_s13, [#allocation3]  }
  0x13   :  { %s310_s28 = scalar_lea.hbm %s462_s1, 256 }
  0x14   :  { %p311_p8 = scmp.ne.s32.totalorder %s462_s1, %s310_s28  ;;  %p314_p9 = scmp.lt.u32.totalorder %s310_s28, %s462_s1 }
  0x16   :  { %p316_p10 = pnand %p314_p9, %p311_p8 }
  0x18   :  { %319 = shalt.err (!%p316_p10)
}
  0x19   :  { %s320_s6 = scalar_lea.vmem %s394_s15, 256  ;;  %p325_p12 = scmp.lt.s32.totalorder %s394_s15, %s394_s15 }
  0x1a   :  { %p321_p11 = scmp.ne.s32.totalorder %s394_s15, %s320_s6  ;;  %p326_p13 = scmp.lt.s32.totalorder %s320_s6, %s320_s6 }
  0x1c   :  { %p327_p0 = por %p326_p13, %p325_p12 }
  0x1e   :  { %p328_p1 = pnand %p327_p0, %p321_p11 }
  0x20   :  { %331 = shalt.err (!%p328_p1)
}
  0x21   :  { %s362_s0 = smov 128   ;;  %s363_s7 = smov 8  }
  0x22   :  { %32 = dma.hbm_to_vmem [thread:$0]  %s462_s1, 256, %s394_s15, [#allocation6], %s362_s0, %s362_s0, %s363_s7  }
  0x23   :  { %354 = dma.done.wait [#allocation3], 128  }
  0x24   :  { %355 = vsyncadd [#allocation3], 4294967168 }
  0x25   :  { %356 = dma.done.wait [#allocation6], 256  }
  0x26   :  { %357 = vsyncadd [#allocation6], 4294967040  ;;  %v364_v0 = vmov 0.0|0.0   ;;  %vm365_vm0 = vmmov 0   ;;  %v366_v1 = vmov 0.0   ;;  %v42_v2 = vld [vmem:[#allocation5] sm:$0xff] }
  0x27   :  { %263 = vmatprep.subr.bf16.mxu0 %v364_v0  ;;  %260 = vmatprep.mubr.msk.f32.mxu0 %vm365_vm0, %v366_v1  ;;  %v43_v3 = vld [vmem:[#allocation5 + $0x8] sm:$0xff]  ;;  %v41_v5 = vld [vmem:[#allocation2] sm:$0xff]  ;;  %vm51_vm1 = vcmask 130048   ;;  %v367_v20 = vmov 683565275   ;;  %s373_s1 = smov [#allocation7]  }
  0x28   :  { %v264_v4 = vpack.c.bf16 %v43_v3, %v42_v2  ;;  %v247_v6 = vld [vmem:[%s463_s2] ss:$0 sm:$0xff]  ;;  %v368_v22 = vmov 2475754826   ;;  %v369_v25 = vmov 2131351028  }
  0x29   :  { %v370_v28 = vmov 2102212464   ;;  %v371_v31 = vmov 920167782   ;;  %v372_v34 = vmov 1326507024  }
  0x2a   :  { %265 = vmatpush3.bf16.msra.mxu0 %v264_v4  ;;  %s237_s2 = sshll.u32 %s373_s1, 4  ;;  %vm229_vm14 = vcmask 261120   ;;  %s238_s2 = int_to_ptr.vmem [resolvable:$true] %s237_s2 }
  0x2b   :  { %s332_s12 = scalar_lea.vmem %s238_s2, 128  ;;  %p337_p3 = scmp.lt.s32.totalorder %s238_s2, %s238_s2 }
  0x2c   :  { %p333_p2 = scmp.ne.s32.totalorder %s238_s2, %s332_s12  ;;  %p338_p4 = scmp.lt.s32.totalorder %s332_s12, %s332_s12 }
  0x2d   :  { %261 = vmatmul.mubr.msk.f32.vlgmr.msra.gmra.mrb[0].mxu0 %vm51_vm1, %v41_v5 }
  0x2e   :  { %p339_p5 = por %p338_p4, %p337_p3 }
  0x30   :  { %p340_p6 = pnand %p339_p5, %p333_p2 }
 0x100   :  { %v121_v7 = vpop.f32.mrb[0].mxu0 }
 0x101   :  { %v428_v8 = vadd.f32 %v247_v6, %v121_v7  ;;  %v262_v9 = vpop.f32.mrb[1].mxu0 }
 0x103   :  { %v128_v10 = vand.u32 2139095040, %v428_v8  ;;  %v125_v14 = vand.u32 2147483647, %v428_v8  ;;  %vm127_vm9 = vcmp.lt.s32.totalorder %v428_v8, 0  ;;  %vm217_vm15 = vweird.f32 %v428_v8 }
 0x105   :  { %v129_v11 = vshrl.u32 %v128_v10, 23  ;;  %v132_v17 = vand.u32 8388607, %v125_v14  ;;  %vm126_vm10 = vcmp.le.f32.partialorder %v125_v14, 0.7853982 }
 0x107   :  { %v249_v12 = vadd.s32 4294967169, %v129_v11  ;;  %v133_v36 = vor.u32 8388608, %v132_v17 }
 0x109   :  { %v135_v13 = vadd.s32 1, %v249_v12  ;;  %v173_v50 = vshll.u32 %v133_v36, 8 }
 0x10b   :  { %vm136_vm2 = vcmp.gt.s32.totalorder %v135_v13, 0 }
 0x10c   :  { %v137_v15 = vsel %vm136_vm2, %v135_v13, 0 }
 0x10d   :  { %v139_v16 = vand.u32 31, %v137_v15  ;;  %v138_v19 = vshrl.u32 %v137_v15, 5 }
 0x10f   :  { %v140_v18 = vsub.s32 32, %v139_v16  ;;  %v142_v21 = vshll.u32 %v367_v20, %v139_v16  ;;  %v145_v23 = vshll.u32 %v368_v22, %v139_v16  ;;  %v148_v27 = vshll.u32 %v369_v25, %v139_v16 }
 0x110   :  { %v151_v30 = vshll.u32 %v370_v28, %v139_v16  ;;  %v154_v33 = vshll.u32 %v371_v31, %v139_v16  ;;  %vm157_vm3 = vcmp.lt.s32.totalorder %v138_v19, 1  ;;  %vm160_vm4 = vcmp.lt.s32.totalorder %v138_v19, 4 }
 0x111   :  { %v143_v24 = vshrl.u32 %v368_v22, %v140_v18  ;;  %v146_v26 = vshrl.u32 %v369_v25, %v140_v18  ;;  %v149_v29 = vshrl.u32 %v370_v28, %v140_v18  ;;  %v152_v32 = vshrl.u32 %v371_v31, %v140_v18 }
 0x112   :  { %v155_v35 = vshrl.u32 %v372_v34, %v140_v18  ;;  %v141_v45 = vshrl.u32 %v367_v20, %v140_v18  ;;  %vm159_vm5 = vcmp.lt.s32.totalorder %v138_v19, 3  ;;  %vm158_vm6 = vcmp.lt.s32.totalorder %v138_v19, 2 }
 0x113   :  { %v144_v37 = vor.u32 %v143_v24, %v142_v21  ;;  %v147_v38 = vor.u32 %v146_v26, %v145_v23  ;;  %v150_v39 = vor.u32 %v149_v29, %v148_v27  ;;  %v153_v40 = vor.u32 %v152_v32, %v151_v30 }
 0x114   :  { %v156_v41 = vor.u32 %v155_v35, %v154_v33 }
 0x115   :  { %v162_v42 = vsel %vm160_vm4, %v150_v39, 2102212464  ;;  %v165_v43 = vsel %vm157_vm3, %v144_v37, %v147_v38  ;;  %v169_v44 = vsel %vm157_vm3, %v147_v38, %v150_v39  ;;  %v166_v46 = vsel %vm160_vm4, %v153_v40, 920167782 }
 0x116   :  { %v170_v47 = vsel %vm160_vm4, %v156_v41, 1326507024  ;;  %v167_v48 = vsel %vm159_vm5, %v150_v39, %v166_v46  ;;  %v161_v51 = vsel %vm157_vm3, %v141_v45, %v144_v37  ;;  %v163_v52 = vsel %vm159_vm5, %v147_v38, %v162_v42 }
 0x117   :  { %v171_v49 = vsel %vm159_vm5, %v153_v40, %v170_v47  ;;  %v168_v53 = vsel %vm158_vm6, %v165_v43, %v167_v48  ;;  %v164_v59 = vsel %vm158_vm6, %v161_v51, %v163_v52 }
 0x118   :  { %v172_v54 = vsel %vm158_vm6, %v169_v44, %v171_v49  ;;  %v437_v57 = vmul.u32.u64.low %v173_v50, %v168_v53  ;;  %v438_v58 = vmul.u32.u64.high %v173_v50, %v168_v53, %v437_v57  ;;  %v180_v61 = vmul.u32 %v173_v50, %v164_v59 }
 0x119   :  { %v434_v55 = vmul.u32.u64.low %v173_v50, %v172_v54  ;;  %v435_v56 = vmul.u32.u64.high %v173_v50, %v172_v54, %v434_v55 }
 0x11a   :  { %v183_v60 = vadd.s32 1, %v438_v58 }
 0x11b   :  { %vm182_vm7 = vc.u32 %v435_v56, %v437_v57  ;;  %v181_v10 = vadd.s32 %v437_v57, %v435_v56 }
 0x11c   :  { %v184_v62 = vsel %vm182_vm7, %v183_v60, %v438_v58 }
 0x11d   :  { %v185_v63 = vadd.s32 %v184_v62, %v180_v61 }
 0x11f   :  { %v186_v0 = vadd.s32 536870912, %v185_v63 }
 0x121   :  { %v187_v1 = vshrl.u32 %v186_v0, 30 }
 0x123   :  { %v188_v2 = vshll.u32 %v187_v1, 30  ;;  %v211_v23 = vsub.s32 4, %v187_v1 }
 0x125   :  { %v189_v3 = vsub.s32 %v185_v63, %v188_v2  ;;  %v212_v26 = vsel %vm127_vm9, %v211_v23, %v187_v1 }
 0x126   :  { %v214_v28 = vsel %vm126_vm10, 0, %v212_v26 }
 0x127   :  { %v191_v4 = vsub.s32 0, %v189_v3  ;;  %v218_v29 = vadd.s32 3, %v214_v28 }
 0x129   :  { %v250_v5 = vmin.u32 %v191_v4, %v189_v3  ;;  %v219_v30 = vand.u32 3, %v218_v29 }
 0x12b   :  { %v193_v6 = vclz %v250_v5  ;;  %vm224_vm11 = vcmp.eq.s32.totalorder %v219_v30, 2  ;;  %vm221_vm12 = vcmp.eq.s32.totalorder %v219_v30, 0  ;;  %vm220_vm13 = vcmp.lt.s32.totalorder %v219_v30, 2 }
 0x12d   :  { %v251_v7 = vadd.s32 4294967294, %v193_v6 }
 0x12f   :  { %vm252_vm8 = vcmp.lt.s32.totalorder %v251_v7, 0 }
 0x130   :  { %v196_v9 = vsel %vm252_vm8, 0, %v251_v7 }
 0x131   :  { %v197_v11 = vsub.s32 32, %v196_v9  ;;  %v201_v12 = vsub.s32 4294967266, %v196_v9  ;;  %v198_v13 = vshll.u32 %v189_v3, %v196_v9 }
 0x133   :  { %v199_v15 = vshrl.u32 %v181_v10, %v197_v11  ;;  %v202_v16 = vadd.s32 127, %v201_v12 }
 0x135   :  { %v200_v17 = vor.u32 %v199_v15, %v198_v13  ;;  %v203_v18 = vshll.u32 %v202_v16, 23 }
 0x137   :  { %v204_v19 = vor.u32 4788187, %v203_v18  ;;  %v207_v21 = vcvt.s32.f32 %v200_v17 }
 0x139   :  { %v205_v20 = vand.u32 2147483647, %v204_v19 }
 0x13b   :  { %v208_v22 = vmul.f32 %v207_v21, %v205_v20 }
 0x13d   :  { %v209_v24 = vxor.u32 2147483648, %v208_v22 }
 0x13f   :  { %v210_v25 = vsel %vm127_vm9, %v209_v24, %v208_v22 }
 0x140   :  { %v213_v27 = vsel %vm126_vm10, %v428_v8, %v210_v25 }
 0x141   :  { %284 = vcosq.f32 %v213_v27 }
 0x142   :  { %286 = vsinq.f32 %v213_v27 }
 0x14b   :  { %v285_v31 = vpop.eup %284 }
 0x14c   :  { %v287_v32 = vpop.eup %286  ;;  %v225_v33 = vxor.u32 2147483648, %v285_v31 }
 0x14d   :  { %v222_v34 = vxor.u32 2147483648, %v287_v32 }
 0x14e   :  { %v226_v35 = vsel %vm224_vm11, %v225_v33, %v287_v32 }
 0x14f   :  { %v223_v14 = vsel %vm221_vm12, %v285_v31, %v222_v34 }
 0x150   :  { %v227_v36 = vsel %vm220_vm13, %v223_v14, %v226_v35 }
 0x151   :  { %v228_v37 = vsel %vm217_vm15, nan, %v227_v36 }
 0x152   :  { %230 = vst.msk [vmem:[#allocation7] sm:$0xff] %vm229_vm14, %v228_v37 }
 0x153   :  { %343 = shalt.err (!%p340_p6)
}
 0x154   :  { %s344_s15 = scalar_lea.hbm %s464_s3, 128 }
 0x155   :  { %p345_p7 = scmp.ne.s32.totalorder %s464_s3, %s344_s15  ;;  %p348_p8 = scmp.lt.u32.totalorder %s344_s15, %s464_s3 }
 0x157   :  { %p350_p9 = pnand %p348_p8, %p345_p7 }
 0x159   :  { %353 = shalt.err (!%p350_p9)
}
 0x15a   :  { %240 = dma.vmem_to_hbm [thread:$0]  %s238_s2, 128, %s464_s3, [#allocation4]  }
 0x15b   :  { %358 = dma.done.wait [#allocation4], 128  }
 0x15c   :  { %359 = vsyncadd [#allocation4], 4294967168 }
 0x15d   :  { %244 = vsyncpa [#allocation3], 1 }
 0x15e   :  { %245 = vsyncpa [#allocation6], 1 }
 0x15f   :  { %246 = vsyncpa [#allocation4], 1 }

</bundles_post_ra>
